<compile_context>
chip_gen: v7x
topology: tpu7x:2x2x1
jax: 0.10.0
libtpu: 0.0.40
codegen_flags: <defaults>
</compile_context>

<pallas_src>
import functools

import jax
import jax.numpy as jnp
from jax import lax
from jax.experimental import pallas as pl
from jax.experimental.pallas import tpu as pltpu


def _round_up(x: int, m: int) -> int:
    return ((x + m - 1) // m) * m


def _token_embedding_body(
    # scalar-prefetch ref (SMEM)
    ids_ref,
    # inputs
    table_hbm, gamma_ref, beta_ref, bits_ref,
    # outputs
    out_ref,
    # scratch
    gathered, copy_sem,
    *, block_tokens: int, hidden: int, eps: float,
    drop_threshold: int, keep_scale: float,
):
    tile = pl.program_id(0)
    num_tiles = pl.num_programs(0)
    slot = tile % 2

    def issue_gather(tile_idx, dst_slot):
        base = tile_idx * block_tokens

        @pl.loop(0, block_tokens)
        def _issue(t):
            tok = ids_ref[base + t]
            pltpu.make_async_copy(
                table_hbm.at[tok], gathered.at[dst_slot, t], copy_sem.at[dst_slot]
            ).start()

    # Prologue: the very first tile gathers its own rows into slot 0.
    @pl.when(tile == 0)
    def _():
        issue_gather(0, 0)

    # Cross-tile prefetch: issue the NEXT tile's row DMAs into the other slot
    # before waiting on the current slot, so descriptor issue + HBM latency
    # overlap this tile's LayerNorm / dropout / output writeback.
    @pl.when(tile + 1 < num_tiles)
    def _():
        issue_gather(tile + 1, 1 - slot)

    # Single aggregate wait sized to the whole tile: all row copies are
    # equal-sized and the DMA semaphore is additive, so one wait of
    # bt * H_pad elements is equivalent to bt per-row waits.
    pltpu.make_async_copy(
        table_hbm.at[pl.ds(0, block_tokens)], gathered.at[slot], copy_sem.at[slot]
    ).wait()

    # ---- LayerNorm: fused single-pass statistics (E[x], E[x^2]). ----
    # Padded hidden columns are zero in the table/gamma/beta, so the sums only
    # pick up real columns; divide by the true hidden size.
    x = gathered[slot].astype(jnp.float32)                 # [bt, H_pad]
    inv_h = jnp.float32(1.0 / float(hidden))
    s1 = jnp.sum(x, axis=-1, keepdims=True)
    s2 = jnp.sum(x * x, axis=-1, keepdims=True)
    mu = s1 * inv_h
    var = s2 * inv_h - mu * mu
    inv = lax.rsqrt(var + jnp.float32(eps))
    y = (x - mu) * inv * gamma_ref[...] + beta_ref[...]

    # ---- Dropout (training): precomputed bits + integer threshold compare. ----
    if bits_ref is not None:
        keep = bits_ref[...] >= jnp.int32(drop_threshold)   # signed compare only
        y = jnp.where(keep, y * jnp.float32(keep_scale), 0.0)

    # Lane-dense full-width tile store.
    out_ref[...] = y.astype(out_ref.dtype)


def token_embedding_forward(input_tokens, emb_table, gamma, beta, *,
                            dropout_prob=0.1, train=False, seed=0,
                            block_tokens=512, eps=1e-5, out_dtype=None):
    """Pallas implementation of TokenEmbedding.forward(input_token)."""
    batch_dims = tuple(input_tokens.shape)
    rows, hidden = emb_table.shape
    out_dtype = out_dtype or emb_table.dtype

    ids = input_tokens.reshape(-1).astype(jnp.int32)
    n = int(ids.shape[0])

    # Token-row tile: multiple of 8, no larger than needed for this call.
    bt = _round_up(min(int(block_tokens), _round_up(n, 8)), 8)
    n_pad = _round_up(n, bt)
    if n_pad != n:
        ids = jnp.pad(ids, (0, n_pad - n))          # pad with token id 0 (valid)
    num_tiles = n_pad // bt

    # Lane-dense hidden: zero-pad embedding width to a multiple of 128.
    h_pad = _round_up(hidden, 128)
    table = emb_table
    if h_pad != hidden:
        table = jnp.pad(table, ((0, 0), (0, h_pad - hidden)))
    # The aggregate drain builds a (bt, h_pad) descriptor over the table; keep
    # at least bt rows so that descriptor stays in bounds.
    if rows < bt:
        table = jnp.pad(table, ((0, bt - rows), (0, 0)))

    gamma2 = jnp.pad(gamma.reshape(1, hidden).astype(jnp.float32),
                     ((0, 0), (0, h_pad - hidden)))
    beta2 = jnp.pad(beta.reshape(1, hidden).astype(jnp.float32),
                    ((0, 0), (0, h_pad - hidden)))

    use_dropout = bool(train) and float(dropout_prob) > 0.0
    drop_threshold = 0
    keep_scale = 1.0
    extra_inputs = ()
    extra_specs = []
    if use_dropout:
        # Uniform 32-bit bits generated outside the kernel (portable; the
        # on-chip PRNG has no lowering outside real Mosaic).  Drop an element
        # iff its bits (as uint32) fall below p * 2^32; compare in int32 space.
        thr_u32 = min(int(round(float(dropout_prob) * 2.0 ** 32)), 2 ** 32 - 1)
        drop_threshold = thr_u32 - 2 ** 31
        keep_scale = 1.0 / (1.0 - float(dropout_prob))
        raw = jax.random.bits(jax.random.PRNGKey(int(seed)), (n_pad, h_pad),
                              dtype=jnp.uint32)
        bits = lax.bitcast_convert_type(raw, jnp.int32)
        extra_inputs = (bits,)
        extra_specs = [pl.BlockSpec((bt, h_pad), lambda i, ids_sm: (i, 0))]

    body = functools.partial(
        _token_embedding_body, block_tokens=bt, hidden=hidden, eps=float(eps),
        drop_threshold=int(drop_threshold), keep_scale=float(keep_scale))

    if use_dropout:
        def kernel(ids_ref, table_hbm, gamma_ref, beta_ref, bits_ref,
                   out_ref, gathered, copy_sem):
            body(ids_ref, table_hbm, gamma_ref, beta_ref, bits_ref,
                 out_ref, gathered, copy_sem)
    else:
        def kernel(ids_ref, table_hbm, gamma_ref, beta_ref,
                   out_ref, gathered, copy_sem):
            body(ids_ref, table_hbm, gamma_ref, beta_ref, None,
                 out_ref, gathered, copy_sem)

    # VMEM budget: double-buffered gather scratch + pipelined out (+bits) tiles.
    tab_isz = jnp.dtype(table.dtype).itemsize
    out_isz = jnp.dtype(out_dtype).itemsize
    need = (2 * bt * h_pad * tab_isz               # gather scratch (2 slots)
            + 2 * bt * h_pad * out_isz             # double-buffered out blocks
            + (2 * bt * h_pad * 4 if use_dropout else 0)
            + 4 * h_pad * 4 + (2 << 20))
    vmem_limit = int(min(max(2 * need, 32 << 20), 64 << 20))

    out_flat = pl.pallas_call(
        kernel,
        out_shape=jax.ShapeDtypeStruct((n_pad, h_pad), out_dtype),
        grid_spec=pltpu.PrefetchScalarGridSpec(
            num_scalar_prefetch=1,                 # flat token ids -> SMEM
            grid=(num_tiles,),
            in_specs=[
                pl.BlockSpec(memory_space=pl.ANY),                    # table (HBM)
                pl.BlockSpec((1, h_pad), lambda i, ids_sm: (0, 0)),   # gamma
                pl.BlockSpec((1, h_pad), lambda i, ids_sm: (0, 0)),   # beta
                *extra_specs,                                         # dropout bits
            ],
            out_specs=pl.BlockSpec((bt, h_pad), lambda i, ids_sm: (i, 0)),
            scratch_shapes=[
                pltpu.VMEM((2, bt, h_pad), table.dtype),   # double-buffered gather
                pltpu.SemaphoreType.DMA((2,)),             # one DMA sem per slot
            ],
        ),
        compiler_params=pltpu.CompilerParams(
            # Cross-tile prefetch carries scratch state across grid steps, so
            # the token axis must stay sequential.
            dimension_semantics=("arbitrary",),
            vmem_limit_bytes=vmem_limit,
        ),
    )(ids, table, gamma2, beta2, *extra_inputs)

    return out_flat[:n, :hidden].reshape(*batch_dims, hidden)


def _reference(tokens, table, gamma, beta, eps=1e-5):
    x = table[tokens]
    mu = x.mean(axis=-1, keepdims=True)
    var = ((x - mu) ** 2).mean(axis=-1, keepdims=True)
    return (x - mu) * lax.rsqrt(var + eps) * gamma + beta


if __name__ == "__main__":
    key = jax.random.PRNGKey(0)
    k_emb, k_g, k_b, k_tok = jax.random.split(key, 4)

    vocab_size, hidden = 50, 32
    batch, seq = 2, 8
    dropout_prob = 0.1

    emb_table = (0.02 * jax.random.normal(k_emb, (vocab_size + 2, hidden))).astype(jnp.float32)
    gamma = (1.0 + 0.1 * jax.random.normal(k_g, (hidden,))).astype(jnp.float32)
    beta = (0.1 * jax.random.normal(k_b, (hidden,))).astype(jnp.float32)
    tokens = jax.random.randint(k_tok, (batch, seq), 0, vocab_size + 2, dtype=jnp.int32)

    # Eval mode (dropout disabled) — must match the pure-JAX reference.
    # block_tokens=8 -> 2 tiles, exercising the cross-tile gather prefetch.
    out = token_embedding_forward(tokens, emb_table, gamma, beta,
                                  dropout_prob=dropout_prob, train=False,
                                  block_tokens=8)
    out = jax.block_until_ready(out)
    ref = _reference(tokens, emb_table, gamma, beta)
    assert out.shape == (batch, seq, hidden)
    err = float(jnp.max(jnp.abs(out - ref)))
    assert err < 1e-3, err

    # Train mode — exercises the dropout path (external bits + in-kernel mask).
    out_tr = token_embedding_forward(tokens, emb_table, gamma, beta,
                                     dropout_prob=dropout_prob, train=True,
                                     seed=123, block_tokens=8)
    out_tr = jax.block_until_ready(out_tr)
    assert out_tr.shape == (batch, seq, hidden)
    dropped = (out_tr == 0.0)
    drop_frac = float(jnp.mean(dropped))
    assert 0.0 < drop_frac < 0.5, drop_frac
    # Kept elements carry the inverted-dropout scale 1/(1-p).
    assert bool(jnp.allclose(
        jnp.where(dropped, 0.0, out_tr * (1.0 - dropout_prob)),
        jnp.where(dropped, 0.0, ref), atol=1e-3, rtol=1e-3))

    print("KERNEL_OK")
</pallas_src>

<mosaic_0001>
module attributes {stable_mosaic.version = 11 : i64} {
  func.func @kernel(%arg0: i32, %arg1: memref<16xi32, #tpu.memory_space<smem>>, %arg2: memref<52x128xf32, #tpu.memory_space<any>>, %arg3: memref<1x128xf32, #tpu.memory_space<vmem>>, %arg4: memref<1x128xf32, #tpu.memory_space<vmem>>, %arg5: memref<8x128xf32, #tpu.memory_space<vmem>>, %arg6: memref<2x8x128xf32, #tpu.memory_space<vmem>>, %arg7: memref<2x!tpu.dma_semaphore, #tpu.memory_space<semaphore_mem>>) attributes {dimension_semantics = [#tpu.dimension_semantics<arbitrary>], iteration_bounds = array<i64: 2>, scalar_prefetch = 1 : i64, scratch_operands = 2 : i64, tpu.core_type = #tpu.core_type<tc>, window_params = [{}, {pipeline_mode = #tpu.pipeline_mode<synchronous>, transform_indices = @transform_1, window_bounds = array<i64: 1, 128>}, {pipeline_mode = #tpu.pipeline_mode<synchronous>, transform_indices = @transform_2, window_bounds = array<i64: 1, 128>}, {transform_indices = @transform_3, window_bounds = array<i64: 8, 128>}]} {
    %c2_i32 = arith.constant 2 : i32
    %c0_i32 = arith.constant 0 : i32
    %0 = arith.cmpi eq, %c2_i32, %c0_i32 : i32
    %c1_i32 = arith.constant 1 : i32
    %1 = arith.select %0, %c1_i32, %c2_i32 : i32
    %2 = arith.remsi %arg0, %1 : i32
    %c0_i32_0 = arith.constant 0 : i32
    %3 = arith.cmpi ne, %2, %c0_i32_0 : i32
    %c0_i32_1 = arith.constant 0 : i32
    %4 = arith.cmpi slt, %2, %c0_i32_1 : i32
    %c0_i32_2 = arith.constant 0 : i32
    %5 = arith.cmpi slt, %1, %c0_i32_2 : i32
    %6 = arith.xori %4, %5 : i1
    %7 = arith.andi %6, %3 : i1
    %8 = arith.addi %2, %1 : i32
    %9 = arith.select %7, %8, %2 : i32
    %c0_i32_3 = arith.constant 0 : i32
    %10 = arith.cmpi eq, %arg0, %c0_i32_3 : i32
    %11 = arith.extui %10 : i1 to i32
    %c0_i32_4 = arith.constant 0 : i32
    %12 = arith.cmpi ne, %11, %c0_i32_4 : i32
    scf.if %12 {
      %c0_i32_23 = arith.constant 0 : i32
      %c8_i32 = arith.constant 8 : i32
      %50 = arith.addi %c0_i32_23, %c8_i32 : i32
      %c1_i32_24 = arith.constant 1 : i32
      scf.for %arg8 = %c0_i32_23 to %50 step %c1_i32_24  : i32 {
        %c1_i32_26 = arith.constant 1 : i32
        %51 = arith.muli %arg8, %c1_i32_26 : i32
        %c0_i32_27 = arith.constant 0 : i32
        %52 = arith.addi %c0_i32_27, %51 : i32
        %c0_i32_28 = arith.constant 0 : i32
        %53 = arith.addi %c0_i32_28, %52 : i32
        %54 = arith.index_cast %53 : i32 to index
        %55 = memref.load %arg1[%54] : memref<16xi32, #tpu.memory_space<smem>>
        %c0_i32_29 = arith.constant 0 : i32
        %c0_i32_30 = arith.constant 0 : i32
        %c0_i32_31 = arith.constant 0 : i32
        %56 = tpu.memref_slice %arg2[%55, %c0_i32_31] : memref<52x128xf32, #tpu.memory_space<any>> -> memref<1x128xf32, #tpu.memory_space<any>>
        %57 = tpu.memref_squeeze %56 : memref<1x128xf32, #tpu.memory_space<any>> -> memref<128xf32, #tpu.memory_space<any>>
        %c0_i32_32 = arith.constant 0 : i32
        %58 = tpu.memref_slice %arg6[%c0_i32_29, %52, %c0_i32_32] : memref<2x8x128xf32, #tpu.memory_space<vmem>> -> memref<1x1x128xf32, #tpu.memory_space<vmem>>
        %59 = tpu.memref_squeeze %58 : memref<1x1x128xf32, #tpu.memory_space<vmem>> -> memref<128xf32, #tpu.memory_space<vmem>>
        %60 = tpu.memref_slice %arg7[%c0_i32_30] : memref<2x!tpu.dma_semaphore, #tpu.memory_space<semaphore_mem>> -> memref<1x!tpu.dma_semaphore, #tpu.memory_space<semaphore_mem>>
        %61 = tpu.memref_squeeze %60 : memref<1x!tpu.dma_semaphore, #tpu.memory_space<semaphore_mem>> -> memref<!tpu.dma_semaphore, #tpu.memory_space<semaphore_mem>>
        tpu.enqueue_dma source(%57 : memref<128xf32, #tpu.memory_space<any>>) target(%59 : memref<128xf32, #tpu.memory_space<vmem>>) target_semaphore(%61 : memref<!tpu.dma_semaphore, #tpu.memory_space<semaphore_mem>>)
      }
      %c8_i32_25 = arith.constant 8 : i32
    } else {
    }
    %c1_i32_5 = arith.constant 1 : i32
    %13 = arith.addi %arg0, %c1_i32_5 : i32
    %c2_i32_6 = arith.constant 2 : i32
    %14 = arith.cmpi slt, %13, %c2_i32_6 : i32
    %15 = arith.extui %14 : i1 to i32
    %c0_i32_7 = arith.constant 0 : i32
    %16 = arith.cmpi ne, %15, %c0_i32_7 : i32
    scf.if %16 {
      %c1_i32_23 = arith.constant 1 : i32
      %50 = arith.addi %arg0, %c1_i32_23 : i32
      %c1_i32_24 = arith.constant 1 : i32
      %51 = arith.subi %c1_i32_24, %9 : i32
      %c8_i32 = arith.constant 8 : i32
      %52 = arith.muli %50, %c8_i32 : i32
      %c0_i32_25 = arith.constant 0 : i32
      %c8_i32_26 = arith.constant 8 : i32
      %53 = arith.addi %c0_i32_25, %c8_i32_26 : i32
      %c1_i32_27 = arith.constant 1 : i32
      scf.for %arg8 = %c0_i32_25 to %53 step %c1_i32_27  : i32 {
        %c1_i32_29 = arith.constant 1 : i32
        %54 = arith.muli %arg8, %c1_i32_29 : i32
        %c0_i32_30 = arith.constant 0 : i32
        %55 = arith.addi %c0_i32_30, %54 : i32
        %56 = arith.addi %52, %55 : i32
        %57 = arith.index_cast %56 : i32 to index
        %58 = memref.load %arg1[%57] : memref<16xi32, #tpu.memory_space<smem>>
        %c0_i32_31 = arith.constant 0 : i32
        %59 = tpu.memref_slice %arg2[%58, %c0_i32_31] : memref<52x128xf32, #tpu.memory_space<any>> -> memref<1x128xf32, #tpu.memory_space<any>>
        %60 = tpu.memref_squeeze %59 : memref<1x128xf32, #tpu.memory_space<any>> -> memref<128xf32, #tpu.memory_space<any>>
        %c0_i32_32 = arith.constant 0 : i32
        %61 = tpu.memref_slice %arg6[%51, %55, %c0_i32_32] : memref<2x8x128xf32, #tpu.memory_space<vmem>> -> memref<1x1x128xf32, #tpu.memory_space<vmem>>
        %62 = tpu.memref_squeeze %61 : memref<1x1x128xf32, #tpu.memory_space<vmem>> -> memref<128xf32, #tpu.memory_space<vmem>>
        %63 = tpu.memref_slice %arg7[%51] : memref<2x!tpu.dma_semaphore, #tpu.memory_space<semaphore_mem>> -> memref<1x!tpu.dma_semaphore, #tpu.memory_space<semaphore_mem>>
        %64 = tpu.memref_squeeze %63 : memref<1x!tpu.dma_semaphore, #tpu.memory_space<semaphore_mem>> -> memref<!tpu.dma_semaphore, #tpu.memory_space<semaphore_mem>>
        tpu.enqueue_dma source(%60 : memref<128xf32, #tpu.memory_space<any>>) target(%62 : memref<128xf32, #tpu.memory_space<vmem>>) target_semaphore(%64 : memref<!tpu.dma_semaphore, #tpu.memory_space<semaphore_mem>>)
      }
      %c8_i32_28 = arith.constant 8 : i32
    } else {
    }
    %c0_i32_8 = arith.constant 0 : i32
    %c0_i32_9 = arith.constant 0 : i32
    %17 = tpu.memref_slice %arg2[%c0_i32_8, %c0_i32_9] : memref<52x128xf32, #tpu.memory_space<any>> -> memref<8x128xf32, #tpu.memory_space<any>>
    %c0_i32_10 = arith.constant 0 : i32
    %c0_i32_11 = arith.constant 0 : i32
    %18 = tpu.memref_slice %arg6[%9, %c0_i32_10, %c0_i32_11] : memref<2x8x128xf32, #tpu.memory_space<vmem>> -> memref<1x8x128xf32, #tpu.memory_space<vmem>>
    %19 = tpu.memref_squeeze %18 : memref<1x8x128xf32, #tpu.memory_space<vmem>> -> memref<8x128xf32, #tpu.memory_space<vmem>>
    %20 = tpu.memref_slice %arg7[%9] : memref<2x!tpu.dma_semaphore, #tpu.memory_space<semaphore_mem>> -> memref<1x!tpu.dma_semaphore, #tpu.memory_space<semaphore_mem>>
    %21 = tpu.memref_squeeze %20 : memref<1x!tpu.dma_semaphore, #tpu.memory_space<semaphore_mem>> -> memref<!tpu.dma_semaphore, #tpu.memory_space<semaphore_mem>>
    tpu.wait_dma2 semaphore(%21 : memref<!tpu.dma_semaphore, #tpu.memory_space<semaphore_mem>>) src(%17 : memref<8x128xf32, #tpu.memory_space<any>>) dst(%19 : memref<8x128xf32, #tpu.memory_space<vmem>>)
    %22 = arith.index_cast %9 : i32 to index
    %c0 = arith.constant 0 : index
    %c0_12 = arith.constant 0 : index
    %23 = vector.load %arg6[%22, %c0, %c0_12] : memref<2x8x128xf32, #tpu.memory_space<vmem>>, vector<1x8x128xf32>
    %24 = vector.shape_cast %23 : vector<1x8x128xf32> to vector<8x128xf32>
    %cst = arith.constant dense<0.000000e+00> : vector<8xf32>
    %25 = vector.multi_reduction <add>, %24, %cst [1] : vector<8x128xf32> to vector<8xf32>
    %26 = vector.shape_cast %25 : vector<8xf32> to vector<8x1xf32>
    %27 = arith.mulf %24, %24 : vector<8x128xf32>
    %cst_13 = arith.constant dense<0.000000e+00> : vector<8xf32>
    %28 = vector.multi_reduction <add>, %27, %cst_13 [1] : vector<8x128xf32> to vector<8xf32>
    %29 = vector.shape_cast %28 : vector<8xf32> to vector<8x1xf32>
    %cst_14 = arith.constant 3.125000e-02 : f32
    %30 = vector.broadcast %cst_14 : f32 to vector<8x1xf32>
    %31 = arith.mulf %26, %30 : vector<8x1xf32>
    %cst_15 = arith.constant 3.125000e-02 : f32
    %32 = vector.broadcast %cst_15 : f32 to vector<8x1xf32>
    %33 = arith.mulf %29, %32 : vector<8x1xf32>
    %34 = arith.mulf %31, %31 : vector<8x1xf32>
    %35 = arith.subf %33, %34 : vector<8x1xf32>
    %cst_16 = arith.constant 9.99999974E-6 : f32
    %36 = vector.broadcast %cst_16 : f32 to vector<8x1xf32>
    %37 = arith.addf %35, %36 : vector<8x1xf32>
    %38 = math.rsqrt %37 : vector<8x1xf32>
    %39 = vector.broadcast %31 : vector<8x1xf32> to vector<8x128xf32>
    %40 = arith.subf %24, %39 : vector<8x128xf32>
    %41 = vector.broadcast %38 : vector<8x1xf32> to vector<8x128xf32>
    %42 = arith.mulf %40, %41 : vector<8x128xf32>
    %c0_17 = arith.constant 0 : index
    %c0_18 = arith.constant 0 : index
    %43 = vector.load %arg3[%c0_17, %c0_18] : memref<1x128xf32, #tpu.memory_space<vmem>>, vector<1x128xf32>
    %44 = vector.broadcast %43 : vector<1x128xf32> to vector<8x128xf32>
    %45 = arith.mulf %42, %44 : vector<8x128xf32>
    %c0_19 = arith.constant 0 : index
    %c0_20 = arith.constant 0 : index
    %46 = vector.load %arg4[%c0_19, %c0_20] : memref<1x128xf32, #tpu.memory_space<vmem>>, vector<1x128xf32>
    %47 = vector.broadcast %46 : vector<1x128xf32> to vector<8x128xf32>
    %48 = arith.addf %45, %47 : vector<8x128xf32>
    %c0_21 = arith.constant 0 : index
    %c0_22 = arith.constant 0 : index
    %49 = vector.load %arg5[%c0_21, %c0_22] : memref<8x128xf32, #tpu.memory_space<vmem>>, vector<8x128xf32>
    tpu.vector_store %arg5[%c0_21, %c0_22], %48 {strides = array<i32>} : memref<8x128xf32, #tpu.memory_space<vmem>>, vector<8x128xf32>,
    return
  }
  func.func @transform_1(%arg0: i32, %arg1: memref<16xi32, #tpu.memory_space<smem>>) -> (i32, i32) {
    %c0_i32 = arith.constant 0 : i32
    %c0_i32_0 = arith.constant 0 : i32
    %c0_i32_1 = arith.constant 0 : i32
    return %c0_i32, %c0_i32_0 : i32, i32
  }
  func.func @transform_2(%arg0: i32, %arg1: memref<16xi32, #tpu.memory_space<smem>>) -> (i32, i32) {
    %c0_i32 = arith.constant 0 : i32
    %c0_i32_0 = arith.constant 0 : i32
    %c0_i32_1 = arith.constant 0 : i32
    return %c0_i32, %c0_i32_0 : i32, i32
  }
  func.func @transform_3(%arg0: i32, %arg1: memref<16xi32, #tpu.memory_space<smem>>) -> (i32, i32) {
    %c0_i32 = arith.constant 0 : i32
    %c0_i32_0 = arith.constant 0 : i32
    return %arg0, %c0_i32 : i32, i32
  }
}

</mosaic_0001>

<bundles_post_ra>
// kernel: tpu_custom_call.1
= control target key start
LH: loop header
LB: loop body
LE: loop exit
PB: predicated region body
PF: predicated region fallthrough
CT: control target
= control target key end

     0   :  { %s763_s0 = inlined_call_operand.hbm [shape: s32[16], index: 0, kind: input, shape index: {}]   ;;  %s764_s1 = inlined_call_operand.hbm [shape: f32[52,128], index: 1, kind: input, shape index: {}]   ;;  %s765_s2 = inlined_call_operand.vmem [shape: f32[1,128], index: 2, kind: input, shape index: {}]   ;;  %s766_s3 = inlined_call_operand.vmem [shape: f32[1,128], index: 3, kind: input, shape index: {}]   ;;  %s767_s4 = inlined_call_operand.hbm [shape: f32[16,128], index: 4, kind: output, shape index: {}]  }
   0x1   :  { %s412_s17 = scalar_lea.hbm %s763_s0, 16 }
   0x2   :  { %p413_p0 = scmp.ne.s32.totalorder %s763_s0, %s412_s17  ;;  %p416_p1 = scmp.lt.u32.totalorder %s412_s17, %s763_s0 }
   0x4   :  { %p418_p2 = pnand %p416_p1, %p413_p0 }
   0x6   :  { %421 = shalt.err (!%p418_p2)  }
   0x7   :  { %s554_s22 = smov [#allocation5]  }
   0x8   :  { %10 = dma.hbm_to_smem %s763_s0, 16, %s554_s22, [#allocation4] }
   0x9   :  { %522 = dma.done.wait [#allocation4], 16 }
   0xa   :  { %523 = vsyncadd [#allocation4], 4294967280 }
   0xb   :  { %12 = sfence }
   0xc   :  { %13 = vsyncpa [#allocation7], 0 }
   0xd   :  { %15 = vsyncpa [#allocation7 + $0x1], 0  ;;  %s595_s25 = smov 0   ;;  %s597_s26 = smov 0  }
   0xe   :  { %s599_s27 = smov 0   ;;  %s601_s28 = smov 0  }
   0xf LB: > { %772 = sst [smem:[#allocation17_spill]] %s540_s27  ;;  %s616_s0 = sadd.s32 4294967295, %s544_s28   ;;  %s544_s28 = sphi %s601_s28, %s783_s28   ;;  %s540_s27 = sphi %s599_s27, %s785_s27   ;;  %s536_s26 = sphi %s597_s26, %s787_s26   ;;  %s532_s25 = sphi %s595_s25, %s786_s25  }
  0x10   : > { %s330_s29 = sadd.s32 4294967294, %s544_s28   ;;  %s620_s30 = sadd.s32 1, %s544_s28  }
  0x11   : > { %773 = sst [smem:[#allocation18_spill]] %s620_s30  ;;  %s70_s5 = sadd.s32 1, %s540_s27 }
  0x12   : > { %s67_s6 = ssub.s32 %s544_s28, %s620_s30  ;;  %p80_p3 = scmp.ne.s32.totalorder %s540_s27, %s536_s26 }
  0x13   : > { %p68_p4 = scmp.eq.s32.totalorder %s67_s6, 0  ;;  %p81_p5 = scmp.eq.s32.totalorder %s616_s0, 1 }
  0x14   : > { %p86_p6 = scmp.ne.s32.totalorder %s536_s26, %s532_s25  ;;  %p87_p7 = scmp.eq.s32.totalorder %s330_s29, 1 }
  0x15   : > { %s631_s7 = scalar_select %p68_p4, %s540_s27, %s70_s5  }
  0x16   : > { %p633_p8 = por %p81_p5, %p80_p3  ;;  %p637_p9 = por %p87_p7, %p86_p6 }
  0x17   : > { %774 = sst [smem:[#allocation19_spill]] %s631_s7  ;;  %p332_p10 = scmp.ge.s32.totalorder %s544_s28, 1 }
  0x18   : > { %s776_s9 = scalar_select %p637_p9, 1, 0 }
  0x19   : > { %p111_p11 = scmp.lt.s32.totalorder %s544_s28, 3 }
  0x1b   : > { %p112_p12 = pnand %p332_p10, %p111_p11 }
  0x1d   : > { %115 = sbr.rel (%p112_p12) target bundleno = 329 (0x149), region = 28 }
  0x24   : > { %s768_s10 = sand.u32 1, %s536_s26   ;;  %p128_p13 = scmp.lt.s32.totalorder %s616_s0, 0 }
  0x25   : > { %s647_s11 = sshll.u32 %s768_s10, 3  ;;  %s129_s12 = ssub.s32 0, %s616_s0 }
  0x26   : > { %s334_s13 = smin.u32 %s616_s0, %s129_s12  ;;  %p337_p1 = scmp.ne.s32.totalorder %s616_s0, 0 }
  0x27   : > { %s131_s14 = sand.u32 1, %s334_s13   ;;  %s655_s18 = smov (!%p337_p1), 0  }
  0x28   : > { %s132_s15 = ssub.s32 0, %s131_s14  ;;  %143 = sbr.rel (%p337_p1) target bundleno = 86 (0x56), region = 32 }
  0x29   : > { %s789_s15 = smov (!%p128_p13, %s132_s15), %s131_s14 }
  0x2a   : > { %p336_p0 = scmp.lt.s32.totalorder %s789_s15, 0  ;;  %s138_s16 = sadd.s32 2, %s789_s15 }
  0x2c   : > { %s791_s16 = smov (!%p336_p0, %s138_s16), %s789_s15 }
  0x2f LB: >> { %s150_s19 = sld [smem:[#allocation5 + %s548_s18]]  ;;  %s153_s20 = scalar_lea.vmem [#allocation2], %s548_s18  ;;  %s548_s18 = sphi %s655_s18, %s149_s18  }
  0x30   : >> { %s161_s21 = sshll.u32 %s153_s20, 4  ;;  %s424_s13 = scalar_lea.hbm %s764_s1, 896  ;;  %s162_s21 = int_to_ptr.vmem [resolvable:$true] %s161_s21 }
  0x35   : >> { %s338_s22 = sshll.u32 %s150_s19, 4 }
  0x36   : >> { %s152_s29 = scalar_lea.hbm %s764_s1, %s338_s22 }
  0x37   : >> { %s422_s5 = scalar_lea.hbm %s152_s29, 16  ;;  %p425_p3 = scmp.lt.u32.totalorder %s152_s29, %s764_s1 }
  0x38   : >> { %p423_p2 = scmp.ne.s32.totalorder %s152_s29, %s422_s5  ;;  %p426_p4 = scmp.lt.u32.totalorder %s424_s13, %s422_s5 }
  0x39   : >> { %p428_p6 = scmp.lt.u32.totalorder %s422_s5, %s152_s29 }
  0x3a   : >> { %p427_p5 = por %p426_p4, %p425_p3 }
  0x3c   : >> { %p429_p7 = por %p428_p6, %p427_p5 }
  0x3e   : >> { %p430_p10 = pnand %p429_p7, %p423_p2 }
  0x40   : >> { %433 = shalt.err (!%p430_p10)  }
  0x41   : >> { %s434_s19 = scalar_lea.vmem %s162_s21, 16  ;;  %s555_s20 = smov [#allocation2]  }
  0x42   : >> { %p435_p11 = scmp.ne.s32.totalorder %s162_s21, %s434_s19  ;;  %s436_s22 = sshll.u32 %s555_s20, 4  ;;  %s437_s22 = int_to_ptr.vmem [resolvable:$false] %s436_s22 }
  0x43   : >> { %s438_s23 = scalar_lea.vmem %s437_s22, 256  ;;  %p439_p12 = scmp.lt.s32.totalorder %s162_s21, %s437_s22 }
  0x44   : >> { %p440_p13 = scmp.lt.s32.totalorder %s438_s23, %s434_s19 }
  0x46   : >> { %p441_p0 = por %p440_p13, %p439_p12 }
  0x48   : >> { %p442_p1 = pnand %p441_p0, %p435_p11 }
  0x4a   : >> { %445 = shalt.err (!%p442_p1)  }
  0x4b   : >> { %164 = dma.hbm_to_vmem [thread:$0]  %s152_s29, 16, %s162_s21, [#allocation3] }
  0x4c   : >> { %s149_s18 = sadd.s32 1, %s548_s18  }
  0x4d   : >> { %p146_p9 = scmp.ge.s32.totalorder %s149_s18, 8  }
  0x4f   : > { %148 = sbr.rel (!%p146_p9) target bundleno = 47 (0x2f), region = 98 }
  0x56 PF: > { %s165_s24 = sadd.s32 1, %s616_s0 }
  0x57   : > { %p339_p2 = scmp.ge.s32.totalorder %s165_s24, 2 }
  0x58   : > { %s170_s5 = ssub.s32 (!%p339_p2), 1, %s791_s16  ;;  %s352_s6 = sshll.u32 (!%p339_p2), %s616_s0, 3 }
  0x59   : > { %169 = sbr.rel (%p339_p2) target bundleno = 142 (0x8e), region = 47  ;;  %s677_s12 = sadd.s32 (!%p339_p2), 8, %s352_s6 }
  0x5a   : > { %777 = sst [smem:[#allocation20_spill]] (!%p339_p2), %s677_s12  ;;  %s679_s13 = smov (!%p339_p2), 0  }
  0x60 LB: >> { %s778_s12 = sld [smem:[#allocation20_spill]]  ;;  %s342_s18 = sshll.u32 %s170_s5, 3  ;;  %s552_s13 = sphi %s679_s13, %s177_s13  }
  0x61   : >> { %s183_s29 = sadd.s32 %s552_s13, %s342_s18  ;;  %s185_s6 = scalar_lea.sflag [#allocation3], %s170_s5 }
  0x62   : >> { %s184_s15 = scalar_lea.vmem [#allocation2], %s183_s29  ;;  %s448_s27 = scalar_lea.hbm %s764_s1, 896 }
  0x63   : >> { %s193_s19 = sshll.u32 %s184_s15, 4  ;;  %s194_s19 = int_to_ptr.vmem [resolvable:$true] %s193_s19 }
  0x66   : >> { %s178_s21 = sadd.s32 %s552_s13, %s778_s12 }
  0x67   : >> { %s179_s14 = sld [smem:[#allocation5 + %s178_s21]] }
  0x6d   : >> { %s341_s20 = sshll.u32 %s179_s14, 4 }
  0x6e   : >> { %s181_s24 = scalar_lea.hbm %s764_s1, %s341_s20 }
  0x6f   : >> { %s446_s10 = scalar_lea.hbm %s181_s24, 16  ;;  %p449_p3 = scmp.lt.u32.totalorder %s181_s24, %s764_s1 }
  0x70   : >> { %p447_p9 = scmp.ne.s32.totalorder %s181_s24, %s446_s10  ;;  %p450_p4 = scmp.lt.u32.totalorder %s448_s27, %s446_s10 }
  0x71   : >> { %p452_p6 = scmp.lt.u32.totalorder %s446_s10, %s181_s24 }
  0x72   : >> { %p451_p5 = por %p450_p4, %p449_p3 }
  0x74   : >> { %p453_p7 = por %p452_p6, %p451_p5 }
  0x76   : >> { %p454_p10 = pnand %p453_p7, %p447_p9 }
  0x78   : >> { %457 = shalt.err (!%p454_p10)  }
  0x79   : >> { %s458_s18 = scalar_lea.vmem %s194_s19, 16  ;;  %s556_s21 = smov [#allocation2]  }
  0x7a   : >> { %p459_p11 = scmp.ne.s32.totalorder %s194_s19, %s458_s18  ;;  %s460_s29 = sshll.u32 %s556_s21, 4  ;;  %s461_s29 = int_to_ptr.vmem [resolvable:$false] %s460_s29 }
  0x7b   : >> { %s462_s14 = scalar_lea.vmem %s461_s29, 256  ;;  %p463_p12 = scmp.lt.s32.totalorder %s194_s19, %s461_s29 }
  0x7c   : >> { %p464_p13 = scmp.lt.s32.totalorder %s462_s14, %s458_s18 }
  0x7e   : >> { %p465_p0 = por %p464_p13, %p463_p12 }
  0x80   : >> { %p466_p1 = pnand %p465_p0, %p459_p11 }
  0x82   : >> { %469 = shalt.err (!%p466_p1)  }
  0x83   : >> { %196 = dma.hbm_to_vmem [thread:$0]  %s181_s24, 16, %s194_s19, %s185_s6 }
  0x84   : >> { %s177_s13 = sadd.s32 1, %s552_s13  }
  0x85   : >> { %p174_p2 = scmp.ge.s32.totalorder %s177_s13, 8  }
  0x87   : > { %176 = sbr.rel (!%p174_p2) target bundleno = 96 (0x60), region = 109 }
  0x8e PF: > { %s343_s27 = sshll.u32 %s791_s16, 3  ;;  %s199_s7 = scalar_lea.sflag [#allocation3], %s791_s16 }
  0x8f   : > { %s198_s30 = scalar_lea.vmem [#allocation2], %s343_s27 }
  0x90   : > { %524 = dma.done.wait %s199_s7, 128 }
  0x91   : > { %525 = vsyncadd %s199_s7, 4294967168  ;;  %v203_v0 = vld [vmem:[%s198_s30] sm:$0xff]  ;;  %s347_s12 = sshll.u32 %s616_s0, 7  ;;  %s779_s13 = scalar_lea.vmem [#allocation6], %s647_s11 }
  0x92   : > { %204 = vadd.xlane.f32.xlu0 %v203_v0  ;;  %v206_v1 = vmul.f32 %v203_v0, %v203_v0  ;;  %v344_v11 = vld [vmem:[%s765_s2] ss:$0 sm:$0xff]  ;;  %s248_s15 = sshll.u32 %s779_s13, 4  ;;  %s717_s22 = scalar_lea.hbm %s767_s4, %s347_s12  ;;  %s719_s15 = int_to_ptr.vmem [resolvable:$true] %s248_s15 }
  0x93   : > { %v345_v13 = vld [vmem:[%s766_s3] ss:$0 sm:$0xff]  ;;  %s780_s23 = smov %s779_s13  ;;  %s781_s24 = sand.u32 1, %s536_s26  }
  0x94   : > { %s235_s6 = scalar_lea.sflag [#allocation7], %s781_s24  ;;  %s470_s18 = scalar_lea.vmem %s719_s15, 128 }
  0x95   : > { %p471_p9 = scmp.ne.s32.totalorder %s719_s15, %s470_s18  ;;  %s557_s0 = smov [#allocation6]  }
  0x96   : > { %207 = vadd.xlane.f32.xlu0 %v206_v1  ;;  %s474_s21 = sshll.u32 %s557_s0, 4  ;;  %s475_s21 = int_to_ptr.vmem [resolvable:$false] %s474_s21 }
  0x97   : > { %p472_p3 = pnand %p471_p9, %p633_p8  ;;  %s476_s29 = scalar_lea.vmem %s475_s21, 256 }
  0x98   : > { %p477_p5 = scmp.lt.s32.totalorder %s719_s15, %s475_s21  ;;  %p478_p6 = scmp.lt.s32.totalorder %s476_s29, %s470_s18 }
  0x99   : > { %p473_p4 = pneg %p472_p3 }
  0x9a   : > { %p479_p7 = por %p478_p6, %p477_p5 }
  0x9c   : > { %p480_p10 = pnand %p479_p7, %p473_p4 }
 0x11f   : > { %v205_v2 = vpop.xlane.xlu0 %204 }
 0x120   : > { %v209_v3 = vmul.f32 0.03125, %v205_v2 }
 0x122   : > { %v211_v5 = vmul.f32 %v209_v3, %v209_v3  ;;  %v215_v9 = vsub.f32 %v203_v0, %v209_v3 }
 0x123   : > { %v208_v4 = vpop.xlane.xlu0 %207 }
 0x124   : > { %v210_v6 = vmul.f32 0.03125, %v208_v4 }
 0x126   : > { %v212_v7 = vsub.f32 %v210_v6, %v211_v5 }
 0x128   : > { %v213_v8 = vadd.f32 1e-05, %v212_v7 }
 0x12a   : > { %410 = vrsqrt.f32 %v213_v8 }
 0x134   : > { %v411_v10 = vpop.eup %410 }
 0x135   : > { %v216_v12 = vmul.f32 %v411_v10, %v215_v9 }
 0x137   : > { %v224_v14 = vmul.f32 %v344_v11, %v216_v12 }
 0x139   : > { %v232_v15 = vadd.f32 %v345_v13, %v224_v14 }
 0x13b   : > { %233 = vst [vmem:[%s780_s23] sm:$0xff] %v232_v15 }
 0x13c   : > { %483 = shalt.err (!%p480_p10)
}
 0x13d   : > { %s484_s11 = scalar_lea.hbm %s717_s22, 128  ;;  %s488_s30 = scalar_lea.hbm %s767_s4, 256 }
 0x13e   : > { %p485_p11 = scmp.ne.s32.totalorder %s717_s22, %s484_s11  ;;  %p489_p0 = scmp.lt.u32.totalorder %s717_s22, %s767_s4 }
 0x13f   : > { %p490_p1 = scmp.lt.u32.totalorder %s488_s30, %s484_s11  ;;  %p492_p9 = scmp.lt.u32.totalorder %s484_s11, %s717_s22 }
 0x140   : > { %p486_p12 = pnand %p485_p11, %p633_p8 }
 0x141   : > { %p491_p2 = por %p490_p1, %p489_p0 }
 0x142   : > { %p487_p13 = pneg %p486_p12 }
 0x143   : > { %p493_p3 = por %p492_p9, %p491_p2 }
 0x145   : > { %p494_p4 = pnand %p493_p3, %p487_p13 }
 0x147   : > { %497 = shalt.err (!%p494_p4)
}
 0x148   : > { %354 = dma.vmem_to_hbm [thread:$0]  (%p633_p8), %s719_s15, 128, %s717_s22, %s235_s6  }
 0x149 PF: > { %p360_p5 = scmp.ge.s32.totalorder %s544_s28, 2  ;;  %s260_s16 = sand.u32 1, %s532_s25  }
 0x14a   : > { %p782_p6 = scmp.ne.s32.totalorder %s776_s9, 0  ;;  %s261_s17 = scalar_lea.sflag [#allocation7], %s260_s16 }
 0x14c   : > { %p357_p7 = pnand %p360_p5, %p782_p6 }
 0x14e   : > { %527 = dma.done.wait (!%p357_p7), %s261_s17, 128  }
 0x14f   : > { %529 = vsyncadd (!%p357_p7), %s261_s17, 4294967168  ;;  %s783_s28 = sld [smem:[#allocation18_spill]]  ;;  %s784_s5 = sld [smem:[#allocation17_spill]] }
 0x150   : > { %s785_s27 = sld [smem:[#allocation19_spill]]  ;;  %s786_s25 = smov %s536_s26 }
 0x155   : > { %p18_p10 = scmp.ge.s32.totalorder %s783_s28, 4   ;;  %s787_s26 = smov %s784_s5 }
 0x157   :  { %20 = sbr.rel (!%p18_p10) target bundleno = 15 (0xf), region = 120 }
 0x15e   :  { %266 = vsyncpa [#allocation7], 1 }
 0x15f   :  { %268 = vsyncpa [#allocation7 + $0x1], 1 }
 0x160   :  { %269 = vsyncmov [#allocation3] }
 0x163   :  { %s270_s8 = vpop.sfrf %269 }
 0x164   :  { %p350_p8 = scmp.ne.s32.totalorder %s270_s8, 0 }
 0x166   :  { %274 = shalt.err (%p350_p8)  }
 0x167   :  { %276 = vsyncmov [#allocation3 + $0x1] }
 0x16a   :  { %s277_s9 = vpop.sfrf %276 }
 0x16b   :  { %p351_p11 = scmp.ne.s32.totalorder %s277_s9, 0 }
 0x16d   :  { %281 = shalt.err (%p351_p11)  }

</bundles_post_ra>
